<compile_context>
chip_gen: v5e
topology: v5e:2x2
jax: 0.10.0
libtpu: 0.0.40
codegen_flags: <defaults>
</compile_context>

<pallas_src>
import jax
import jax.numpy as jnp
from jax.experimental import pallas as pl
from jax.experimental.pallas import tpu as pltpu


def _focus_kernel(w_ref, x_ref, shift_ref, o_ref):
    # w_ref: (N, K)  x_ref: (1, K, TS)  shift_ref: (N, 1)  o_ref: (1, N, TS)
    acc = jnp.dot(w_ref[...], x_ref[0], preferred_element_type=jnp.float32)
    y = acc + shift_ref[...]                     # per-channel shift, lane-broadcast
    o_ref[0] = jnp.maximum(y, 0.0).astype(o_ref.dtype)


def _choose_tile_s(S, B, target=4096):
    """Pick a lane-dense spatial tile: multiple of 128 unless it spans all of S."""
    if S <= 128:
        return S
    t = max(128, (min(target, S) // 128) * 128)
    if t >= S:
        # Whole spatial row fits; if batch alone gives < 2 parallel grid steps,
        # split spatially so both TensorCores (v7x) get work.
        if B == 1 and S >= 256:
            return max(128, ((S // 2) // 128) * 128)
        return S
    return t


def focus_matmul_bn_relu(w_scaled, x_k, shift, *, tile_s):
    """w_scaled: (N, K) f32, x_k: (B, K, S) f32, shift: (N, 1) f32 -> (B, N, S) f32."""
    N, K = w_scaled.shape
    B, _, S = x_k.shape
    grid = (B, pl.cdiv(S, tile_s))
    return pl.pallas_call(
        _focus_kernel,
        out_shape=jax.ShapeDtypeStruct((B, N, S), jnp.float32),
        grid_spec=pltpu.PrefetchScalarGridSpec(
            num_scalar_prefetch=0,
            grid=grid,
            in_specs=[
                pl.BlockSpec((N, K), lambda b, j: (0, 0)),          # scaled weight
                pl.BlockSpec((1, K, tile_s), lambda b, j: (b, 0, j)),  # activations
                pl.BlockSpec((N, 1), lambda b, j: (0, 0)),          # folded BN shift
            ],
            out_specs=pl.BlockSpec((1, N, tile_s), lambda b, j: (b, 0, j)),
        ),
        compiler_params=pltpu.CompilerParams(
            dimension_semantics=("parallel", "parallel"),
            vmem_limit_bytes=32 * 1024 * 1024,   # explicit cap; covers v5e's 16 MiB default
        ),
    )(w_scaled, x_k, shift)


def focus_forward(x, params):
    """x: (B, C, H, W) NCHW float32. Returns (B, ch_out, H//2, W//2)."""
    B, C, H, W = x.shape
    H2, W2 = H // 2, W // 2
    S = H2 * W2

    conv_w = params["conv_w"]            # (ch_out, 4C, 1, 1)
    conv_b = params["conv_b"]            # (ch_out,)
    gamma, beta = params["bn_gamma"], params["bn_beta"]
    mean, var, eps = params["bn_mean"], params["bn_var"], params["bn_eps"]
    ch_out = conv_w.shape[0]

    # Fold BN (eval mode) + conv bias:
    #   out = gamma*(Wx + b - mean)/sqrt(var+eps) + beta
    #       = (scale*W) @ x + (beta + scale*(b - mean))
    # TODO(synk): training-mode BatchNorm (batch statistics) is not implemented.
    scale = gamma / jnp.sqrt(var + eps)                               # (ch_out,)
    w_scaled = (conv_w[:, :, 0, 0] * scale[:, None]).astype(jnp.float32)   # (N, K)
    shift = (beta + scale * (conv_b - mean)).reshape(ch_out, 1).astype(jnp.float32)

    # Space-to-depth, produced directly in the channel-major (B, 4C, H2*W2)
    # layout the kernel consumes.  Flattened channel index (2*pw + ph)*C + c
    # matches torch.cat([::2,::2], [1::2,::2], [::2,1::2], [1::2,1::2], dim=1).
    # TODO(synk): fully fusing this rearrangement into the kernel would need
    # in-kernel stride-2 lane/sublane gathers; it is left as one XLA copy.
    x_k = (
        x.reshape(B, C, H2, 2, W2, 2)
        .transpose(0, 5, 3, 1, 2, 4)
        .reshape(B, 4 * C, S)
        .astype(jnp.float32)
    )

    tile_s = _choose_tile_s(S, B)
    y = focus_matmul_bn_relu(w_scaled, x_k, shift, tile_s=tile_s)     # (B, ch_out, S)
    return y.reshape(B, ch_out, H2, W2)       # free reshape -- already NCHW ordered


def init_params(channel, width, key):
    ch_in = channel * 4
    ch_out = 64 // width
    k1, k2, k3, k4, k5, k6 = jax.random.split(key, 6)
    return {
        "conv_w": jax.random.normal(k1, (ch_out, ch_in, 1, 1), jnp.float32) * 0.1,
        "conv_b": jax.random.normal(k2, (ch_out,), jnp.float32) * 0.1,
        "bn_gamma": 1.0 + 0.1 * jax.random.normal(k3, (ch_out,), jnp.float32),
        "bn_beta": 0.1 * jax.random.normal(k4, (ch_out,), jnp.float32),
        "bn_mean": 0.1 * jax.random.normal(k5, (ch_out,), jnp.float32),
        "bn_var": 1.0 + 0.1 * jnp.abs(jax.random.normal(k6, (ch_out,), jnp.float32)),
        "bn_eps": 1e-5,
    }


def focus_reference(x, params):
    """Pure-JAX reference mirroring the PyTorch forward (BN eval mode)."""
    x_cat = jnp.concatenate(
        [x[..., ::2, ::2], x[..., 1::2, ::2], x[..., ::2, 1::2], x[..., 1::2, 1::2]],
        axis=1,
    )
    w = params["conv_w"][:, :, 0, 0]  # (ch_out, 4C)
    conv = jnp.einsum("bchw,oc->bohw", x_cat, w) + params["conv_b"][None, :, None, None]
    inv = 1.0 / jnp.sqrt(params["bn_var"] + params["bn_eps"])
    bn = (conv - params["bn_mean"][None, :, None, None]) * (
        params["bn_gamma"] * inv
    )[None, :, None, None] + params["bn_beta"][None, :, None, None]
    return jnp.maximum(bn, 0.0)


if __name__ == "__main__":
    channel, width = 4, 1          # ch_in = 16, ch_out = 64
    B, H, W = 2, 16, 16

    key = jax.random.PRNGKey(0)
    kx, kp = jax.random.split(key)
    x = jax.random.normal(kx, (B, channel, H, W), jnp.float32)
    params = init_params(channel, width, kp)

    out = focus_forward(x, params)
    out = jax.block_until_ready(out)

    ref = focus_reference(x, params)
    assert out.shape == (B, 64 // width, H // 2, W // 2), out.shape
    assert jnp.allclose(out, ref, atol=1e-4, rtol=1e-4), float(
        jnp.max(jnp.abs(out - ref))
    )

    print("KERNEL_OK")
</pallas_src>

<mosaic_0001>
module attributes {stable_mosaic.version = 11 : i64} {
  func.func @_focus_kernel(%arg0: i32, %arg1: i32, %arg2: memref<64x16xf32, #tpu.memory_space<vmem>>, %arg3: memref<1x16x64xf32, #tpu.memory_space<vmem>>, %arg4: memref<64x1xf32, #tpu.memory_space<vmem>>, %arg5: memref<1x64x64xf32, #tpu.memory_space<vmem>>) attributes {dimension_semantics = [#tpu.dimension_semantics<parallel>, #tpu.dimension_semantics<parallel>], iteration_bounds = array<i64: 2, 1>, scalar_prefetch = 0 : i64, scratch_operands = 0 : i64, tpu.core_type = #tpu.core_type<tc>, window_params = [{pipeline_mode = #tpu.pipeline_mode<synchronous>, transform_indices = @transform_0, window_bounds = array<i64: 64, 16>}, {transform_indices = @transform_1, window_bounds = array<i64: 1, 16, 64>}, {pipeline_mode = #tpu.pipeline_mode<synchronous>, transform_indices = @transform_2, window_bounds = array<i64: 64, 1>}, {transform_indices = @transform_3, window_bounds = array<i64: 1, 64, 64>}]} {
    %c0 = arith.constant 0 : index
    %c0_0 = arith.constant 0 : index
    %0 = vector.load %arg2[%c0, %c0_0] : memref<64x16xf32, #tpu.memory_space<vmem>>, vector<64x16xf32>
    %c0_1 = arith.constant 0 : index
    %c0_2 = arith.constant 0 : index
    %c0_3 = arith.constant 0 : index
    %1 = vector.load %arg3[%c0_1, %c0_2, %c0_3] : memref<1x16x64xf32, #tpu.memory_space<vmem>>, vector<1x16x64xf32>
    %2 = vector.shape_cast %1 : vector<1x16x64xf32> to vector<16x64xf32>
    %cst = arith.constant dense<0.000000e+00> : vector<64x64xf32>
    %3 = tpu.matmul %0, %2, %cst {dimension_numbers = #tpu.dot_dimension_numbers<[1], [0], [0], [1], [0, 0, 1, 1], [], []>} : vector<64x16xf32>, vector<16x64xf32>, vector<64x64xf32> -> vector<64x64xf32>
    %c0_4 = arith.constant 0 : index
    %c0_5 = arith.constant 0 : index
    %4 = vector.load %arg4[%c0_4, %c0_5] : memref<64x1xf32, #tpu.memory_space<vmem>>, vector<64x1xf32>
    %5 = vector.broadcast %4 : vector<64x1xf32> to vector<64x64xf32>
    %6 = arith.addf %3, %5 : vector<64x64xf32>
    %cst_6 = arith.constant 0.000000e+00 : f32
    %7 = vector.broadcast %cst_6 : f32 to vector<64x64xf32>
    %8 = arith.maximumf %6, %7 : vector<64x64xf32>
    %c0_7 = arith.constant 0 : index
    %c0_8 = arith.constant 0 : index
    %c0_9 = arith.constant 0 : index
    %9 = vector.load %arg5[%c0_7, %c0_8, %c0_9] : memref<1x64x64xf32, #tpu.memory_space<vmem>>, vector<1x64x64xf32>
    %10 = vector.shape_cast %9 : vector<1x64x64xf32> to vector<64x64xf32>
    %11 = vector.shape_cast %8 : vector<64x64xf32> to vector<1x64x64xf32>
    tpu.vector_store %arg5[%c0_7, %c0_8, %c0_9], %11 {strides = array<i32>} : memref<1x64x64xf32, #tpu.memory_space<vmem>>, vector<1x64x64xf32>,
    return
  }
  func.func @transform_0(%arg0: i32, %arg1: i32) -> (i32, i32) {
    %c0_i32 = arith.constant 0 : i32
    %c0_i32_0 = arith.constant 0 : i32
    %c0_i32_1 = arith.constant 0 : i32
    return %c0_i32, %c0_i32_0 : i32, i32
  }
  func.func @transform_1(%arg0: i32, %arg1: i32) -> (i32, i32, i32) {
    %c0_i32 = arith.constant 0 : i32
    %c0_i32_0 = arith.constant 0 : i32
    return %arg0, %c0_i32, %arg1 : i32, i32, i32
  }
  func.func @transform_2(%arg0: i32, %arg1: i32) -> (i32, i32) {
    %c0_i32 = arith.constant 0 : i32
    %c0_i32_0 = arith.constant 0 : i32
    %c0_i32_1 = arith.constant 0 : i32
    return %c0_i32, %c0_i32_0 : i32, i32
  }
  func.func @transform_3(%arg0: i32, %arg1: i32) -> (i32, i32, i32) {
    %c0_i32 = arith.constant 0 : i32
    %c0_i32_0 = arith.constant 0 : i32
    return %arg0, %c0_i32, %arg1 : i32, i32, i32
  }
}

</mosaic_0001>

<bundles_post_ra>
// kernel: tpu_custom_call.1
= control target key start
LH: loop header
LB: loop body
LE: loop exit
PB: predicated region body
PF: predicated region fallthrough
CT: control target
= control target key end

     0   :  { %8 = vsyncpa [#allocation3], 0  ;;  %s799_s0 = inlined_call_operand.vmem [shape: f32[64,16], index: 0, kind: input, shape index: {}]   ;;  %s800_s1 = inlined_call_operand.vmem [shape: f32[2,16,64], index: 1, kind: input, shape index: {}]   ;;  %s801_s2 = inlined_call_operand.vmem [shape: f32[64,1], index: 2, kind: input, shape index: {}]   ;;  %s802_s3 = inlined_call_operand.hbm [shape: f32[2,64,64], index: 3, kind: output, shape index: {}]  }
   0x1   :  { %10 = vsyncpa [#allocation3 + $0x1], 0  ;;  %s623_s12 = smov 0   ;;  %s625_s13 = smov 0  }
   0x2   :  { %s627_s14 = smov 0   ;;  %s629_s15 = smov 0  }
   0x3   :  { %s631_s16 = smov 0   ;;  %s633_s17 = smov 0  }
   0x4 LB: > { %s430_s18 = sadd.s32 4294967295, %s598_s17   ;;  %s431_s19 = sadd.s32 4294967294, %s598_s17   ;;  %s598_s17 = sphi %s633_s17, %s16_s17   ;;  %s594_s16 = sphi %s631_s16, %s809_s16   ;;  %s590_s15 = sphi %s629_s15, %s808_s15   ;;  %s586_s14 = sphi %s627_s14, %s807_s14   ;;  %s582_s13 = sphi %s625_s13, %s806_s13   ;;  %s578_s12 = sphi %s623_s12, %s805_s12  }
   0x5   : > { %s28_s20 = sadd.s32 1, %s594_s16  ;;  %s107_s21 = sadd.s32 1, %s586_s14 }
   0x6   : > { %p30_p0 = scmp.ge.s32.totalorder %s28_s20, 2  ;;  %p117_p1 = scmp.ne.s32.totalorder %s586_s14, %s582_s13 }
   0x7   : > { %p118_p2 = scmp.eq.s32.totalorder %s430_s18, 1  ;;  %p123_p3 = scmp.ne.s32.totalorder %s582_s13, %s578_s12 }
   0x8   : > { %s811_s20 = smov (%p30_p0, %s28_s20), 0  ;;  %p124_p5 = scmp.eq.s32.totalorder %s431_s19, 1 }
   0x9   : > { %p663_p4 = por %p118_p2, %p117_p1  ;;  %s102_s23 = ssub.s32 %s594_s16, %s811_s20 }
   0xa   : > { %p434_p6 = scmp.ge.s32.totalorder %s598_s17, 1  ;;  %p105_p7 = scmp.eq.s32.totalorder %s102_s23, 0 }
   0xb   : > { %p670_p8 = por %p124_p5, %p123_p3  ;;  %p159_p9 = scmp.lt.s32.totalorder %s598_s17, 3 }
   0xc   : > { %s676_s25 = scalar_select %p105_p7, %s586_s14, %s107_s21  }
   0xd   : > { %p160_p10 = pnand %p434_p6, %p159_p9 }
   0xe   : > { %p186_p11 = scmp.lt.s32.totalorder (!%p160_p10), %s590_s15, 1  ;;  %s183_s29 = sand.u32 (!%p160_p10), 1, %s582_s13  }
   0xf   : > { %163 = sbr.rel (%p160_p10) target bundleno = 179 (0xb3), region = 32  ;;  %s452_s5 = sshll.u32 (!%p160_p10), %s590_s15, 6 }
  0x10   : > { %s348_s8 = scalar_lea.hbm (!%p160_p10), %s802_s3, %s452_s5  ;;  %s336_s10 = scalar_lea.sflag (!%p160_p10), [#allocation3], %s183_s29 }
  0x11   : > { %s540_s23 = scalar_lea.hbm (!%p160_p10), %s802_s3, 128 }
  0x14   : > { %v206_v0 = vld [vmem:[%s801_s2 + $0x10] sm:$0xff]  ;;  %v204_v1 = vld [vmem:[%s801_s2] sm:$0xff]  ;;  %v600_v2 = vmov 0   ;;  %s187_s30 = scalar_select %p186_p11, %s590_s15, 1  ;;  %vm252_vm0 = vcmask 130048   ;;  %v207_v10 = vld [vmem:[%s801_s2 + $0x18] sm:$0xff] }
  0x15   : > { %518 = vset.pattern.permute.xlu1 %v600_v2  ;;  %517 = vset.pattern.permute.xlu0 %v600_v2  ;;  %v208_v3 = vld [vmem:[%s801_s2 + $0x20] sm:$0xff]  ;;  %v196_v7 = vld [vmem:[%s799_s0 + $0x10] sm:$0xff]  ;;  %v205_v11 = vld [vmem:[%s801_s2 + $0x8] sm:$0xff]  ;;  %vm326_vm1 = vcmask 523264  }
  0x16   : > { %224 = vperm.xlu1 %518, %v206_v0   ;;  %214 = vperm.xlu0 %517, %v204_v1   ;;  %s451_s4 = sshll.u32 %s187_s30, 4  ;;  %v194_v6 = vld [vmem:[%s799_s0] sm:$0xff]  ;;  %v200_v9 = vld [vmem:[%s799_s0 + $0x30] sm:$0xff]  ;;  %v209_v12 = vld [vmem:[%s801_s2 + $0x28] sm:$0xff]  ;;  %s435_s30 = sshll.u32 %s183_s29, 6 }
  0x17   : > { %519 = vset.pattern.permute.xlu2 %v600_v2  ;;  %s193_s9 = scalar_lea.vmem %s800_s1, %s451_s4  ;;  %v198_v8 = vld [vmem:[%s799_s0 + $0x20] sm:$0xff]  ;;  %v195_v13 = vld [vmem:[%s799_s0 + $0x8] sm:$0xff]  ;;  %v197_v14 = vld [vmem:[%s799_s0 + $0x18] sm:$0xff]  ;;  %s742_s4 = scalar_lea.vmem [#allocation2], %s435_s30 }
  0x18   : > { %234 = vperm.xlu2 %519, %v208_v3   ;;  %v203_v4 = vld [vmem:[%s193_s9 + $0x8] sm:$0xff]  ;;  %v202_v5 = vld [vmem:[%s193_s9] sm:$0xff]  ;;  %v201_v16 = vld [vmem:[%s799_s0 + $0x38] sm:$0xff]  ;;  %s349_s15 = sshll.u32 %s742_s4, 4  ;;  %s351_s9 = sshll.u32 %s348_s8, 4  ;;  %s350_s15 = int_to_ptr.vmem [resolvable:$true] %s349_s15  ;;  %s352_s9 = int_to_ptr.hbm [resolvable:$true] %s351_s9 }
  0x19   : > { %291 = vmatpush.msra.mxu0 %v203_v4  ;;  %453 = vmatpush.msra.mxu1 %v203_v4  ;;  %v199_v15 = vld [vmem:[%s799_s0 + $0x28] sm:$0xff]  ;;  %v211_v17 = vld [vmem:[%s801_s2 + $0x38] sm:$0xff]  ;;  %v210_v18 = vld [vmem:[%s801_s2 + $0x30] sm:$0xff]  ;;  %s534_s11 = sshra.s32 %s352_s9, 4  ;;  %s535_s11 = int_to_ptr.hbm [resolvable:$true] %s534_s11 }
  0x1a   : > { %454 = vmatpush.msra.mxu2 %v203_v4  ;;  %455 = vmatpush.msra.mxu3 %v203_v4  ;;  %s536_s18 = scalar_lea.hbm %s535_s11, 64  ;;  %p541_p1 = scmp.lt.s32.totalorder %s535_s11, %s802_s3 }
  0x1b   : > { %292 = vmatpush.msra.mxu0 %v202_v5  ;;  %456 = vmatpush.msra.mxu1 %v202_v5  ;;  %p537_p12 = scmp.ne.s32.totalorder %s535_s11, %s536_s18  ;;  %p542_p2 = scmp.lt.s32.totalorder %s540_s23, %s536_s18 }
  0x1c   : > { %457 = vmatpush.msra.mxu2 %v202_v5  ;;  %458 = vmatpush.msra.mxu3 %v202_v5 }
  0x1d   : > { %438 = vmatmul.msk.f32.vlgmr.msra.gmra.mxu0 %vm252_vm0, %v194_v6  ;;  %440 = vmatmul.msk.f32.vlgmr.msra.gmra.mxu1 %vm252_vm0, %v196_v7  ;;  %p538_p13 = pnand %p537_p12, %p663_p4  ;;  %p543_p3 = por %p542_p2, %p541_p1 }
  0x1e   : > { %442 = vmatmul.msk.f32.vlgmr.msra.gmra.mxu2 %vm252_vm0, %v198_v8  ;;  %444 = vmatmul.msk.f32.vlgmr.msra.gmra.mxu3 %vm252_vm0, %v200_v9 }
  0x1f   : > { %229 = vperm.xlu1 %518, %v207_v10   ;;  %219 = vperm.xlu0 %517, %v205_v11   ;;  %p539_p0 = pneg %p538_p13 }
  0x20   : > { %239 = vperm.xlu2 %519, %v209_v12  }
  0x21   : > { %p544_p5 = pnand %p543_p3, %p539_p0 }
  0x25   : > { %439 = vmatmul.msk.f32.gmra.mxu0 %vm252_vm0, %v195_v13  ;;  %441 = vmatmul.msk.f32.gmra.mxu1 %vm252_vm0, %v197_v14 }
  0x26   : > { %443 = vmatmul.msk.f32.gmra.mxu2 %vm252_vm0, %v199_v15  ;;  %445 = vmatmul.msk.f32.gmra.mxu3 %vm252_vm0, %v201_v16 }
  0x27   : > { %249 = vperm.xlu1 %518, %v211_v17   ;;  %244 = vperm.xlu0 %517, %v210_v18  }
  0x72   : > { %v235_v29 = vpop.permute.xlu2 %234 }
  0x7a   : > { %v240_v44 = vpop.permute.xlu2 %239 }
  0x88   : > { %v215_v19 = vpop.permute.xlu0 %214  ;;  %v225_v20 = vpop.permute.xlu1 %224 }
  0x91   : > { %v220_v21 = vpop.permute.xlu0 %219  ;;  %v230_v28 = vpop.permute.xlu1 %229 }
  0x99   : > { %v245_v30 = vpop.permute.xlu0 %244  ;;  %v250_v43 = vpop.permute.xlu1 %249 }
  0x9a   : > { %v294_v22 = vpop.f32.mrf.mxu0  ;;  %v300_v23 = vpop.f32.mrf.mxu1 }
  0x9b   : > { %v295_v24 = vadd.f32 %v294_v22, %v215_v19  ;;  %v301_v25 = vadd.f32 %v300_v23, %v225_v20 }
  0x9d   : > { %v318_v26 = vmax.f32 %v295_v24, 0.0  ;;  %v320_v27 = vmax.f32 %v301_v25, 0.0 }
  0x9f   : > { %327 = vst.msk [vmem:[%s742_s4] sm:$0xff] %vm326_vm1, %v318_v26 }
  0xa0   : > { %329 = vst.msk [vmem:[%s742_s4 + $0x10] sm:$0xff] %vm326_vm1, %v320_v27 }
  0xa1   : > { %v306_v31 = vpop.f32.mrf.mxu2  ;;  %v312_v32 = vpop.f32.mrf.mxu3 }
  0xa2   : > { %v307_v33 = vadd.f32 %v306_v31, %v235_v29  ;;  %v313_v34 = vadd.f32 %v312_v32, %v245_v30  ;;  %v297_v35 = vpop.f32.mrf.mxu0  ;;  %v303_v36 = vpop.f32.mrf.mxu1 }
  0xa3   : > { %v298_v37 = vadd.f32 %v297_v35, %v220_v21  ;;  %v304_v38 = vadd.f32 %v303_v36, %v230_v28 }
  0xa4   : > { %v322_v39 = vmax.f32 %v307_v33, 0.0  ;;  %v324_v40 = vmax.f32 %v313_v34, 0.0 }
  0xa5   : > { %v319_v41 = vmax.f32 %v298_v37, 0.0  ;;  %v321_v42 = vmax.f32 %v304_v38, 0.0 }
  0xa6   : > { %331 = vst.msk [vmem:[%s742_s4 + $0x20] sm:$0xff] %vm326_vm1, %v322_v39 }
  0xa7   : > { %333 = vst.msk [vmem:[%s742_s4 + $0x30] sm:$0xff] %vm326_vm1, %v324_v40 }
  0xa8   : > { %328 = vst.msk [vmem:[%s742_s4 + $0x8] sm:$0xff] %vm326_vm1, %v319_v41 }
  0xa9   : > { %330 = vst.msk [vmem:[%s742_s4 + $0x18] sm:$0xff] %vm326_vm1, %v321_v42  ;;  %v309_v45 = vpop.f32.mrf.mxu2  ;;  %v315_v46 = vpop.f32.mrf.mxu3 }
  0xaa   : > { %v310_v47 = vadd.f32 %v309_v45, %v240_v44  ;;  %v316_v48 = vadd.f32 %v315_v46, %v250_v43 }
  0xac   : > { %v323_v49 = vmax.f32 %v310_v47, 0.0  ;;  %v325_v50 = vmax.f32 %v316_v48, 0.0 }
  0xae   : > { %332 = vst.msk [vmem:[%s742_s4 + $0x28] sm:$0xff] %vm326_vm1, %v323_v49 }
  0xaf   : > { %334 = vst.msk [vmem:[%s742_s4 + $0x38] sm:$0xff] %vm326_vm1, %v325_v50 }
  0xb0   : > { %547 = shalt.err (!%p544_p5)
}
  0xb1   : > { %s601_s28 = smov 128   ;;  %s602_s29 = smov 8  }
  0xb2   : > { %459 = dma.vmem_to_hbm [thread:$0]  (%p663_p4), %s350_s15, 1024, %s352_s9, %s336_s10, %s601_s28, %s601_s28, %s602_s29  }
  0xb3 PF: > { %p465_p6 = scmp.ge.s32.totalorder %s598_s17, 2  ;;  %s366_s30 = sand.u32 1, %s578_s12  }
  0xb4   : > { %s367_s4 = scalar_lea.sflag [#allocation3], %s366_s30 }
  0xb5   : > { %p462_p7 = pnand %p465_p6, %p670_p8 }
  0xb7   : > { %p463_p9 = pneg %p462_p7 }
  0xb9   : > { %573 = dma.done.wait (%p463_p9), %s367_s4, 1024  }
  0xba   : > { %575 = vsyncadd (%p463_p9), %s367_s4, 4294966272  ;;  %s16_s17 = sadd.s32 1, %s598_s17   ;;  %s805_s12 = smov %s582_s13 }
  0xbb   : > { %p13_p10 = scmp.ge.s32.totalorder %s16_s17, 4   ;;  %s806_s13 = smov %s586_s14 }
  0xbc   : > { %s807_s14 = smov %s676_s25  ;;  %s808_s15 = smov %s594_s16 }
  0xbd   : > { %s809_s16 = smov %s811_s20  ;;  %15 = sbr.rel (!%p13_p10) target bundleno = 4 (0x4), region = 67 }
  0xc2   :  { %373 = vsyncpa [#allocation3], 1 }
  0xc3   :  { %375 = vsyncpa [#allocation3 + $0x1], 1 }

</bundles_post_ra>
